<compile_context>
chip_gen: v7x
topology: tpu7x:2x2x1
jax: 0.10.0
libtpu: 0.0.40
codegen_flags: <defaults>
</compile_context>

<pallas_src>
import functools

import jax
import jax.numpy as jnp
from jax.experimental import pallas as pl
from jax.experimental.pallas import tpu as pltpu

EPS = 1e-6
_LANE = 128


def _round_up(v, m):
    return ((v + m - 1) // m) * m


def _pad_last(a, pad):
    if pad == 0:
        return a
    cfg = [(0, 0)] * (a.ndim - 1) + [(0, pad)]
    return jnp.pad(a, cfg)


def _layer_norm_rows(x_f32, gamma, beta, true_h):
    # PyTorch-reference semantics (unbiased std, eps added to the std).
    # Fused sum / sum-of-squares: the two reductions are independent (no
    # mean -> diff -> sum(diff^2) chain) and zero-padded lanes contribute 0.
    s = jnp.sum(x_f32, axis=-1, keepdims=True)
    ss = jnp.sum(x_f32 * x_f32, axis=-1, keepdims=True)
    mean = s * (1.0 / true_h)
    var = (ss - s * mean) * (1.0 / (true_h - 1.0))
    std = jnp.sqrt(jnp.maximum(var, 0.0))            # guard f32 cancellation
    inv = pl.reciprocal(std + EPS, approx=False)     # exact; EUP slot
    return (x_f32 - mean) * inv * gamma + beta


def _fused_kernel(x_ref, w_ref, b_ref, g_ref, beta_ref, o_ref, *, true_h):
    # Resident-W path: x_ref (tm, Hp); w_ref (Hp, Hp); params (1, Hp).
    x = x_ref[...].astype(jnp.float32)
    normed = _layer_norm_rows(x, g_ref[...], beta_ref[...], true_h)
    y = jnp.dot(normed.astype(w_ref.dtype), w_ref[...],
                preferred_element_type=jnp.float32) + b_ref[...]
    # dropout (eval) = identity; residual add; single lane-dense store.
    o_ref[...] = (x + y).astype(o_ref.dtype)


def _fused_kernel_ntiled(x_ref, xcol_ref, w_ref, b_ref, g_ref, beta_ref,
                         o_ref, normed_ref, *, true_h):
    # Column-blocked path: x_ref (tm, Hp) full row block (reused across j),
    # xcol_ref/o_ref (tm, tn), w_ref (Hp, tn), b_ref (1, tn).
    @pl.when(pl.program_id(1) == 0)
    def _():
        x = x_ref[...].astype(jnp.float32)
        normed_ref[...] = _layer_norm_rows(
            x, g_ref[...], beta_ref[...], true_h).astype(normed_ref.dtype)

    y = jnp.dot(normed_ref[...], w_ref[...],
                preferred_element_type=jnp.float32) + b_ref[...]
    o_ref[...] = (xcol_ref[...].astype(jnp.float32) + y).astype(o_ref.dtype)


def _vmem_capacity_bytes():
    try:
        return int(pltpu.get_tpu_info().vmem_capacity_bytes)
    except Exception:
        return 64 * 1024 * 1024      # conservative: v7x per-TensorCore VMEM


def sublayer_connection(x, w, b, gamma, beta, *, tm=512, tn=256,
                        compute_dtype=jnp.bfloat16,
                        force_n_tiling=None,
                        vmem_limit_bytes=None):
    """Fused y = x + dropout(LayerNorm(x) @ W + b), eval-mode dropout.

    x: (batch, seq, hidden). Returns same shape/dtype.
    tm: row-tile size (main knob; capped by a generation-aware VMEM budget).
    tn: output-column tile for the N-tiled path (256 v6e/v7x, 128 v5e).
    compute_dtype: matmul input dtype (bf16 for v6e/v7x MXU rate; on v5e with
                   hidden < ~1000 use f32 -- the matmul hides under DMA).
    force_n_tiling: None = auto (resident W vs VMEM budget); True/False forces.
    """
    batch, seq, hidden = x.shape
    assert hidden > 1, "unbiased LayerNorm std needs hidden > 1"
    assert w.shape == (hidden, hidden)
    rows = batch * seq

    x_item = jnp.dtype(x.dtype).itemsize
    c_item = jnp.dtype(compute_dtype).itemsize

    # --- lane-dense hidden (multiple of 128) --------------------------------
    H = hidden
    H_pad = _round_up(H, _LANE)
    pad_h = H_pad - H

    x2 = x.reshape(rows, H)
    if pad_h:
        x2 = jnp.pad(x2, ((0, 0), (0, pad_h)))
        w_c = jnp.pad(w, ((0, pad_h), (0, pad_h))).astype(compute_dtype)
    else:
        w_c = w.astype(compute_dtype)
    b2 = _pad_last(b, pad_h).reshape(1, H_pad).astype(jnp.float32)
    g2 = _pad_last(gamma, pad_h).reshape(1, H_pad).astype(jnp.float32)     # a_2
    beta2 = _pad_last(beta, pad_h).reshape(1, H_pad).astype(jnp.float32)   # b_2

    # --- generation-aware VMEM budget --------------------------------------
    vmem_cap = _vmem_capacity_bytes()
    if vmem_cap >= 100 * 1024 * 1024:          # v5e / v6e: 128 MiB per core
        tile_budget = 80 * 1024 * 1024
        auto_limit = 100 * 1024 * 1024
    else:                                      # v7x: 64 MiB per TensorCore
        tile_budget = 22 * 1024 * 1024
        auto_limit = 48 * 1024 * 1024
    auto_limit = min(auto_limit,
                     max(32 * 1024 * 1024, vmem_cap - 16 * 1024 * 1024))
    if vmem_limit_bytes is None:
        vmem_limit_bytes = auto_limit

    # --- resident W vs column-blocked (N-tiled) W ---------------------------
    resident_w_bytes = H_pad * H_pad * c_item
    if force_n_tiling is None:
        use_n_tiling = resident_w_bytes > tile_budget // 3
    else:
        use_n_tiling = bool(force_n_tiling)

    if use_n_tiling:
        tn_req = max(_LANE, (min(int(tn), H_pad) // _LANE) * _LANE)
        tn_eff = tn_req if H_pad % tn_req == 0 else _LANE   # keep blocks even
        nj = H_pad // tn_eff
        if nj <= 1:
            use_n_tiling = False
    if not use_n_tiling:
        tn_eff = H_pad
        nj = 1

    # --- row tile: largest fitting the budget, counting pipeline buffers,
    #     the f32 kernel-body temporaries and (N-tiled) the normed scratch. --
    if use_n_tiling:
        resident = 2 * H_pad * tn_eff * c_item + 2 * tn_eff * 4 + 2 * H_pad * 4
        per_row = (2 * H_pad * x_item            # x full row block, 2 bufs
                   + 4 * tn_eff * x_item         # x column + out, 2 bufs each
                   + H_pad * c_item              # normed scratch
                   + 4 * H_pad * 4               # f32 LN temporaries
                   + 2 * tn_eff * 4)             # y / residual temporaries
    else:
        resident = resident_w_bytes + 3 * H_pad * 4
        per_row = (4 * H_pad * x_item            # x + out, double-buffered
                   + 5 * H_pad * 4)              # f32 temporaries (x, normed, y)

    tm_cap = max(8, (tile_budget - resident) // per_row)
    tm_eff = max(8, (min(int(tm), int(tm_cap)) // 8) * 8)
    tm_eff = min(tm_eff, _round_up(rows, 8))
    # Megacore (v7x) load balance: keep >= 2 row blocks when possible.
    if rows >= 16 and -(-rows // tm_eff) <= 1:
        tm_eff = max(8, _round_up(-(-rows // 2), 8))
    ni = -(-rows // tm_eff)     # ragged tail -> Pallas partial trailing block

    params = pltpu.CompilerParams(
        dimension_semantics=("parallel", "arbitrary")[:2] if use_n_tiling
        else ("parallel",),
        vmem_limit_bytes=int(vmem_limit_bytes))

    if not use_n_tiling:
        cost = pl.CostEstimate(
            flops=2 * rows * H_pad * H_pad,
            transcendentals=2 * rows,
            bytes_accessed=(2 * rows * H_pad * x_item
                            + H_pad * H_pad * c_item + 3 * H_pad * 4))
        out = pl.pallas_call(
            functools.partial(_fused_kernel, true_h=float(H)),
            out_shape=jax.ShapeDtypeStruct((rows, H_pad), x.dtype),
            grid_spec=pltpu.PrefetchScalarGridSpec(
                num_scalar_prefetch=0,
                grid=(ni,),
                in_specs=[
                    # streamed row tiles (double-buffered by the pipeline)
                    pl.BlockSpec((tm_eff, H_pad), lambda i: (i, 0)),
                    # resident operands: constant index map, single-buffered
                    pl.BlockSpec((H_pad, H_pad), lambda i: (0, 0),
                                 pipeline_mode=pl.Buffered(1)),   # W
                    pl.BlockSpec((1, H_pad), lambda i: (0, 0),
                                 pipeline_mode=pl.Buffered(1)),   # bias
                    pl.BlockSpec((1, H_pad), lambda i: (0, 0),
                                 pipeline_mode=pl.Buffered(1)),   # a_2 (gamma)
                    pl.BlockSpec((1, H_pad), lambda i: (0, 0),
                                 pipeline_mode=pl.Buffered(1)),   # b_2 (beta)
                ],
                out_specs=pl.BlockSpec((tm_eff, H_pad), lambda i: (i, 0)),
            ),
            compiler_params=params,
            cost_estimate=cost,
        )(x2, w_c, b2, g2, beta2)
    else:
        cost = pl.CostEstimate(
            flops=2 * rows * H_pad * H_pad,
            transcendentals=2 * rows,
            bytes_accessed=(3 * rows * H_pad * x_item
                            + ni * H_pad * H_pad * c_item + 3 * H_pad * 4))
        out = pl.pallas_call(
            functools.partial(_fused_kernel_ntiled, true_h=float(H)),
            out_shape=jax.ShapeDtypeStruct((rows, H_pad), x.dtype),
            grid_spec=pltpu.PrefetchScalarGridSpec(
                num_scalar_prefetch=0,
                grid=(ni, nj),          # j (output columns) is the inner axis
                in_specs=[
                    # full row block for LN; block index constant across j,
                    # so the pipeline does not re-DMA it per column block.
                    pl.BlockSpec((tm_eff, H_pad), lambda i, j: (i, 0)),
                    # column slice of x for the residual add
                    pl.BlockSpec((tm_eff, tn_eff), lambda i, j: (i, j)),
                    # streamed W / bias column blocks
                    pl.BlockSpec((H_pad, tn_eff), lambda i, j: (0, j)),
                    pl.BlockSpec((1, tn_eff), lambda i, j: (0, j)),
                    # resident LN parameters
                    pl.BlockSpec((1, H_pad), lambda i, j: (0, 0),
                                 pipeline_mode=pl.Buffered(1)),   # a_2
                    pl.BlockSpec((1, H_pad), lambda i, j: (0, 0),
                                 pipeline_mode=pl.Buffered(1)),   # b_2
                ],
                out_specs=pl.BlockSpec((tm_eff, tn_eff), lambda i, j: (i, j)),
                scratch_shapes=[pltpu.VMEM((tm_eff, H_pad), compute_dtype)],
            ),
            compiler_params=params,
            cost_estimate=cost,
        )(x2, x2, w_c, b2, g2, beta2)

    out = out[:, :H] if pad_h else out
    return out.reshape(batch, seq, H)


def reference(x, w, b, gamma, beta):
    """Pure-JAX reference with the module's exact LayerNorm semantics (f32)."""
    xf = x.astype(jnp.float32)
    H = xf.shape[-1]
    mean = jnp.mean(xf, axis=-1, keepdims=True)
    diff = xf - mean
    var = jnp.sum(diff * diff, axis=-1, keepdims=True) / (H - 1)
    std = jnp.sqrt(var)
    normed = diff / (std + EPS) * gamma + beta
    y = jnp.dot(normed, w.astype(jnp.float32),
                preferred_element_type=jnp.float32) + b
    return (xf + y).astype(x.dtype)


if __name__ == "__main__":
    def make_inputs(key, batch, seq, hidden):
        kx, kw, kb, kg, kbeta = jax.random.split(key, 5)
        x = jax.random.normal(kx, (batch, seq, hidden), dtype=jnp.float32)
        w = (jax.random.normal(kw, (hidden, hidden), dtype=jnp.float32)
             * (1.0 / jnp.sqrt(hidden)))
        b = 0.05 * jax.random.normal(kb, (hidden,), dtype=jnp.float32)
        gamma = 1.0 + 0.1 * jax.random.normal(kg, (hidden,), dtype=jnp.float32)
        beta = 0.05 * jax.random.normal(kbeta, (hidden,), dtype=jnp.float32)
        return x, w, b, gamma, beta

    # 1) Module-consistent small shapes (hidden=32 -> lane-padded to 128),
    #    exact-f32 matmul path: tight check vs the f32 reference.
    x, w, b, gamma, beta = make_inputs(jax.random.PRNGKey(0), 2, 8, 32)
    out_f32 = jax.block_until_ready(
        sublayer_connection(x, w, b, gamma, beta, compute_dtype=jnp.float32))
    ref_f32 = reference(x, w, b, gamma, beta)
    assert out_f32.shape == x.shape and out_f32.dtype == x.dtype
    assert jnp.allclose(out_f32, ref_f32, atol=1e-4, rtol=1e-4), \
        "f32 path mismatch vs reference"

    # 2) Default bf16-MXU path (production/perf path on v6e/v7x): must match
    #    within bf16-quantization error.
    out_bf16 = jax.block_until_ready(sublayer_connection(x, w, b, gamma, beta))
    assert out_bf16.shape == x.shape and out_bf16.dtype == x.dtype
    assert jnp.allclose(out_bf16, ref_f32, atol=5e-2, rtol=5e-2), \
        "bf16 path outside bf16-level tolerance vs reference"

    # 3) N-tiled (column-blocked W) path + ragged row count: exercises the
    #    large-hidden v7x code path and Pallas partial trailing blocks
    #    (rows = 3*7 = 21, no wrapper row padding).
    x3, w3, b3, g3, be3 = make_inputs(jax.random.PRNGKey(1), 3, 7, 256)
    out_nt = jax.block_until_ready(
        sublayer_connection(x3, w3, b3, g3, be3, compute_dtype=jnp.float32,
                            force_n_tiling=True, tn=128))
    ref_nt = reference(x3, w3, b3, g3, be3)
    assert out_nt.shape == x3.shape and out_nt.dtype == x3.dtype
    assert jnp.allclose(out_nt, ref_nt, atol=1e-4, rtol=1e-4), \
        "N-tiled path mismatch vs reference"

    print("KERNEL_OK")
</pallas_src>

<mosaic_0001>
module attributes {stable_mosaic.version = 11 : i64} {
  func.func @_fused_kernel(%arg0: i32, %arg1: memref<8x128xf32, #tpu.memory_space<vmem>>, %arg2: memref<128x128xf32, #tpu.memory_space<vmem>>, %arg3: memref<1x128xf32, #tpu.memory_space<vmem>>, %arg4: memref<1x128xf32, #tpu.memory_space<vmem>>, %arg5: memref<1x128xf32, #tpu.memory_space<vmem>>, %arg6: memref<8x128xf32, #tpu.memory_space<vmem>>) attributes {dimension_semantics = [#tpu.dimension_semantics<parallel>], iteration_bounds = array<i64: 2>, scalar_prefetch = 0 : i64, scratch_operands = 0 : i64, tpu.core_type = #tpu.core_type<tc>, window_params = [{transform_indices = @transform_0, window_bounds = array<i64: 8, 128>}, {pipeline_mode = #tpu.pipeline_mode<synchronous>, transform_indices = @transform_1, window_bounds = array<i64: 128, 128>}, {pipeline_mode = #tpu.pipeline_mode<synchronous>, transform_indices = @transform_2, window_bounds = array<i64: 1, 128>}, {pipeline_mode = #tpu.pipeline_mode<synchronous>, transform_indices = @transform_3, window_bounds = array<i64: 1, 128>}, {pipeline_mode = #tpu.pipeline_mode<synchronous>, transform_indices = @transform_4, window_bounds = array<i64: 1, 128>}, {transform_indices = @transform_5, window_bounds = array<i64: 8, 128>}]} {
    %c0 = arith.constant 0 : index
    %c0_0 = arith.constant 0 : index
    %0 = vector.load %arg1[%c0, %c0_0] : memref<8x128xf32, #tpu.memory_space<vmem>>, vector<8x128xf32>
    %c0_1 = arith.constant 0 : index
    %c0_2 = arith.constant 0 : index
    %1 = vector.load %arg4[%c0_1, %c0_2] : memref<1x128xf32, #tpu.memory_space<vmem>>, vector<1x128xf32>
    %c0_3 = arith.constant 0 : index
    %c0_4 = arith.constant 0 : index
    %2 = vector.load %arg5[%c0_3, %c0_4] : memref<1x128xf32, #tpu.memory_space<vmem>>, vector<1x128xf32>
    %cst = arith.constant dense<0.000000e+00> : vector<8xf32>
    %3 = vector.multi_reduction <add>, %0, %cst [1] : vector<8x128xf32> to vector<8xf32>
    %4 = vector.shape_cast %3 : vector<8xf32> to vector<8x1xf32>
    %5 = arith.mulf %0, %0 : vector<8x128xf32>
    %cst_5 = arith.constant dense<0.000000e+00> : vector<8xf32>
    %6 = vector.multi_reduction <add>, %5, %cst_5 [1] : vector<8x128xf32> to vector<8xf32>
    %7 = vector.shape_cast %6 : vector<8xf32> to vector<8x1xf32>
    %cst_6 = arith.constant 3.125000e-02 : f32
    %8 = vector.broadcast %cst_6 : f32 to vector<8x1xf32>
    %9 = arith.mulf %4, %8 : vector<8x1xf32>
    %10 = arith.mulf %4, %9 : vector<8x1xf32>
    %11 = arith.subf %7, %10 : vector<8x1xf32>
    %cst_7 = arith.constant 0.0322580636 : f32
    %12 = vector.broadcast %cst_7 : f32 to vector<8x1xf32>
    %13 = arith.mulf %11, %12 : vector<8x1xf32>
    %cst_8 = arith.constant 0.000000e+00 : f32
    %14 = vector.broadcast %cst_8 : f32 to vector<8x1xf32>
    %15 = arith.maximumf %13, %14 : vector<8x1xf32>
    %16 = math.sqrt %15 : vector<8x1xf32>
    %cst_9 = arith.constant 9.99999997E-7 : f32
    %17 = vector.broadcast %cst_9 : f32 to vector<8x1xf32>
    %18 = arith.addf %16, %17 : vector<8x1xf32>
    %19 = tpu.reciprocal %18 : vector<8x1xf32> -> vector<8x1xf32>
    %20 = vector.broadcast %9 : vector<8x1xf32> to vector<8x128xf32>
    %21 = arith.subf %0, %20 : vector<8x128xf32>
    %22 = vector.broadcast %19 : vector<8x1xf32> to vector<8x128xf32>
    %23 = arith.mulf %21, %22 : vector<8x128xf32>
    %24 = vector.broadcast %1 : vector<1x128xf32> to vector<8x128xf32>
    %25 = arith.mulf %23, %24 : vector<8x128xf32>
    %26 = vector.broadcast %2 : vector<1x128xf32> to vector<8x128xf32>
    %27 = arith.addf %25, %26 : vector<8x128xf32>
    %c0_10 = arith.constant 0 : index
    %c0_11 = arith.constant 0 : index
    %28 = vector.load %arg2[%c0_10, %c0_11] : memref<128x128xf32, #tpu.memory_space<vmem>>, vector<128x128xf32>
    %cst_12 = arith.constant dense<0.000000e+00> : vector<8x128xf32>
    %29 = tpu.matmul %27, %28, %cst_12 {dimension_numbers = #tpu.dot_dimension_numbers<[1], [0], [0], [1], [0, 0, 1, 1], [], []>} : vector<8x128xf32>, vector<128x128xf32>, vector<8x128xf32> -> vector<8x128xf32>
    %c0_13 = arith.constant 0 : index
    %c0_14 = arith.constant 0 : index
    %30 = vector.load %arg3[%c0_13, %c0_14] : memref<1x128xf32, #tpu.memory_space<vmem>>, vector<1x128xf32>
    %31 = vector.broadcast %30 : vector<1x128xf32> to vector<8x128xf32>
    %32 = arith.addf %29, %31 : vector<8x128xf32>
    %33 = arith.addf %0, %32 : vector<8x128xf32>
    %c0_15 = arith.constant 0 : index
    %c0_16 = arith.constant 0 : index
    %34 = vector.load %arg6[%c0_15, %c0_16] : memref<8x128xf32, #tpu.memory_space<vmem>>, vector<8x128xf32>
    tpu.vector_store %arg6[%c0_15, %c0_16], %33 {strides = array<i32>} : memref<8x128xf32, #tpu.memory_space<vmem>>, vector<8x128xf32>,
    return
  }
  func.func @transform_0(%arg0: i32) -> (i32, i32) {
    %c0_i32 = arith.constant 0 : i32
    %c0_i32_0 = arith.constant 0 : i32
    return %arg0, %c0_i32 : i32, i32
  }
  func.func @transform_1(%arg0: i32) -> (i32, i32) {
    %c0_i32 = arith.constant 0 : i32
    %c0_i32_0 = arith.constant 0 : i32
    %c0_i32_1 = arith.constant 0 : i32
    return %c0_i32, %c0_i32_0 : i32, i32
  }
  func.func @transform_2(%arg0: i32) -> (i32, i32) {
    %c0_i32 = arith.constant 0 : i32
    %c0_i32_0 = arith.constant 0 : i32
    %c0_i32_1 = arith.constant 0 : i32
    return %c0_i32, %c0_i32_0 : i32, i32
  }
  func.func @transform_3(%arg0: i32) -> (i32, i32) {
    %c0_i32 = arith.constant 0 : i32
    %c0_i32_0 = arith.constant 0 : i32
    %c0_i32_1 = arith.constant 0 : i32
    return %c0_i32, %c0_i32_0 : i32, i32
  }
  func.func @transform_4(%arg0: i32) -> (i32, i32) {
    %c0_i32 = arith.constant 0 : i32
    %c0_i32_0 = arith.constant 0 : i32
    %c0_i32_1 = arith.constant 0 : i32
    return %c0_i32, %c0_i32_0 : i32, i32
  }
  func.func @transform_5(%arg0: i32) -> (i32, i32) {
    %c0_i32 = arith.constant 0 : i32
    %c0_i32_0 = arith.constant 0 : i32
    return %arg0, %c0_i32 : i32, i32
  }
}

</mosaic_0001>

<bundles_post_ra>
// kernel: tpu_custom_call.1
= control target key start
LH: loop header
LB: loop body
LE: loop exit
PB: predicated region body
PF: predicated region fallthrough
CT: control target
= control target key end

     0   :  { %10 = vsyncpa [#allocation3], 0  ;;  %s1025_s0 = inlined_call_operand.hbm [shape: f32[16,128], index: 0, kind: input, shape index: {}]   ;;  %s1026_s1 = inlined_call_operand.hbm [shape: f32[128,128], index: 1, kind: input, shape index: {}]   ;;  %s1027_s2 = inlined_call_operand.vmem [shape: f32[1,128], index: 2, kind: input, shape index: {}]   ;;  %s1028_s3 = inlined_call_operand.vmem [shape: f32[1,128], index: 3, kind: input, shape index: {}]   ;;  %s1029_s4 = inlined_call_operand.vmem [shape: f32[1,128], index: 4, kind: input, shape index: {}]   ;;  %s1030_s5 = inlined_call_operand.hbm [shape: f32[16,128], index: 5, kind: output, shape index: {}]  }
   0x1   :  { %12 = vsyncpa [#allocation3 + $0x1], 0 }
   0x2   :  { %13 = vsyncpa [#allocation6], 0 }
   0x3   :  { %14 = vsyncpa [#allocation4], 0 }
   0x4   :  { %16 = vsyncpa [#allocation4 + $0x1], 0  ;;  %s809_s18 = smov 0   ;;  %s811_s19 = smov 0  }
   0x5   :  { %s813_s20 = smov 0   ;;  %s815_s21 = smov 0  }
   0x6 LB: > { %s830_s22 = sadd.s32 4294967295, %s769_s21   ;;  %s482_s23 = sadd.s32 4294967294, %s769_s21   ;;  %s769_s21 = sphi %s815_s21, %s1050_s21   ;;  %s765_s20 = sphi %s813_s20, %s1049_s20   ;;  %s761_s19 = sphi %s811_s19, %s1048_s19   ;;  %s757_s18 = sphi %s809_s18, %s1047_s18  }
   0x7   : > { %p42_p0 = scmp.ne.s32.totalorder %s761_s19, %s757_s18  ;;  %p1031_p1 = scmp.eq.s32.totalorder %s830_s22, 0 }
   0x8   : > { %p156_p3 = scmp.eq.s32.totalorder %s482_s23, 1  ;;  %p483_p5 = scmp.ge.s32.totalorder %s769_s21, 1 }
   0x9   : > { %p839_p4 = por %p1031_p1, %p42_p0  ;;  %p163_p7 = scmp.lt.s32.totalorder %s769_s21, 3 }
   0xa   : > { %p844_p6 = por %p156_p3, %p42_p0  ;;  %s771_s27 = smov [#allocation5]  }
   0xb   : > { %s1034_s24 = scalar_select %p839_p4, 1, 0 }
   0xc   : > { %s1035_s25 = scalar_select %p844_p6, 1, 0 }
   0xd   : > { %p849_p8 = pnand %p483_p5, %p163_p7  ;;  %s175_s28 = sshll.u32 %s771_s27, 4  ;;  %s853_s28 = int_to_ptr.vmem [resolvable:$true] %s175_s28 }
   0xe   : > { %s865_s30 = sadd.s32 1, %s769_s21   ;;  %s29_s6 = sadd.s32 1, %s765_s20 }
   0xf   : > { %s1036_s26 = scalar_select %p849_p8, 1, 0 }
  0x10   : > { %p583_p9 = pneg %p849_p8  ;;  %s26_s7 = ssub.s32 %s769_s21, %s865_s30 }
  0x11   : > { %s641_s10 = scalar_lea.hbm %s1026_s1, 2048 }
  0x12   : > { %p860_p11 = pnand %p583_p9, %p1031_p1  ;;  %p642_p12 = scmp.ne.s32.totalorder %s1026_s1, %s641_s10 }
  0x13   : > { %p648_p5 = scmp.lt.u32.totalorder %s641_s10, %s1026_s1 }
  0x14   : > { %p643_p13 = pneg %p860_p11 }
  0x16   : > { %p644_p0 = pnand %p643_p13, %p642_p12 }
  0x18   : > { %p645_p3 = pneg %p644_p0 }
  0x1a   : > { %p650_p7 = pnand %p648_p5, %p645_p3 }
  0x1c   : > { %653 = shalt.err (!%p650_p7)
}
  0x1d   : > { %s654_s15 = scalar_lea.vmem %s853_s28, 2048  ;;  %p662_p2 = scmp.lt.s32.totalorder %s853_s28, %s853_s28 }
  0x1e   : > { %p655_p9 = scmp.ne.s32.totalorder %s853_s28, %s654_s15  ;;  %p663_p6 = scmp.lt.s32.totalorder %s654_s15, %s654_s15 }
  0x20   : > { %p657_p10 = pnand %p655_p9, %p643_p13  ;;  %p664_p4 = por %p663_p6, %p662_p2 }
  0x22   : > { %p658_p1 = pneg %p657_p10 }
  0x24   : > { %p665_p8 = pnand %p664_p4, %p658_p1 }
  0x26   : > { %668 = shalt.err (!%p665_p8)
}
  0x27   : > { %s772_s16 = smov 128   ;;  %s773_s17 = smov 8  }
  0x28   : > { %586 = dma.hbm_to_vmem [thread:$0]  (!%p860_p11), %s1026_s1, 2048, %s853_s28, [#allocation6], %s772_s16, %s772_s16, %s773_s17  }
  0x29   : > { %p27_p2 = scmp.eq.s32.totalorder %s26_s7, 0  ;;  %p36_p1 = scmp.ne.s32.totalorder %s765_s20, %s761_s19 }
  0x2a   : > { %p37_p4 = scmp.eq.s32.totalorder %s769_s21, 0  ;;  %p596_p6 = scmp.lt.s32.totalorder %s769_s21, 2 }
  0x2b   : > { %s896_s8 = scalar_select %p27_p2, %s765_s20, %s29_s6  }
  0x2c   : > { %p38_p8 = por %p37_p4, %p36_p1  ;;  %p1038_p10 = scmp.eq.s32.totalorder %s830_s22, 1 }
  0x2d   : > { %s198_s10 = sand.u32 1, %s765_s20   ;;  %s487_s11 = sshll.u32 %s769_s21, 7 }
  0x2e   : > { %p900_p12 = por %p1038_p10, %p36_p1  ;;  %s486_s12 = sshll.u32 %s198_s10, 3 }
  0x2f   : > { %s909_s14 = scalar_lea.hbm %s1025_s0, %s487_s11  ;;  %s202_s28 = scalar_lea.vmem [#allocation2], %s486_s12 }
  0x30   : > { %s209_s6 = sshll.u32 %s202_s28, 4  ;;  %p911_p11 = pnand %p596_p6, %p38_p8  ;;  %s915_s6 = int_to_ptr.vmem [resolvable:$true] %s209_s6 }
  0x31   : > { %s199_s15 = scalar_lea.sflag [#allocation3], %s198_s10  ;;  %s669_s16 = scalar_lea.hbm %s909_s14, 128 }
  0x32   : > { %p670_p13 = scmp.ne.s32.totalorder %s909_s14, %s669_s16  ;;  %p671_p0 = pneg %p911_p11 }
  0x33   : > { %s674_s27 = scalar_lea.hbm %s1025_s0, 256  ;;  %p675_p7 = scmp.lt.u32.totalorder %s909_s14, %s1025_s0 }
  0x34   : > { %p672_p3 = pnand %p671_p0, %p670_p13  ;;  %p676_p9 = scmp.lt.u32.totalorder %s674_s27, %s669_s16 }
  0x35   : > { %p678_p1 = scmp.lt.u32.totalorder %s669_s16, %s909_s14 }
  0x36   : > { %p673_p5 = pneg %p672_p3  ;;  %p677_p2 = por %p676_p9, %p675_p7 }
  0x38   : > { %p679_p4 = por %p678_p1, %p677_p2 }
  0x3a   : > { %p680_p6 = pnand %p679_p4, %p673_p5 }
  0x3c   : > { %683 = shalt.err (!%p680_p6)
}
  0x3d   : > { %s684_s10 = scalar_lea.vmem %s915_s6, 128  ;;  %s774_s29 = smov [#allocation2]  }
  0x3e   : > { %p685_p8 = scmp.ne.s32.totalorder %s915_s6, %s684_s10  ;;  %s689_s13 = sshll.u32 %s774_s29, 4  ;;  %s690_s13 = int_to_ptr.vmem [resolvable:$false] %s689_s13 }
  0x3f   : > { %s691_s28 = scalar_lea.vmem %s690_s13, 256  ;;  %p692_p3 = scmp.lt.s32.totalorder %s915_s6, %s690_s13 }
  0x40   : > { %p687_p10 = pnand %p685_p8, %p671_p0  ;;  %p693_p7 = scmp.lt.s32.totalorder %s691_s28, %s684_s10 }
  0x42   : > { %p688_p13 = pneg %p687_p10  ;;  %p694_p9 = por %p693_p7, %p692_p3 }
  0x44   : > { %p695_p2 = pnand %p694_p9, %p688_p13 }
  0x46   : > { %698 = shalt.err (!%p695_p2)
}
  0x47   : > { %590 = dma.hbm_to_vmem [thread:$0]  (!%p911_p11), %s909_s14, 128, %s915_s6, %s199_s15  }
  0x48   : > { %p1041_p5 = scmp.ne.s32.totalorder %s1036_s26, 0 }
  0x49   : > { %s945_s16 = sand.u32 (!%p1041_p5), 1, %s761_s19   ;;  %p1042_p0 = scmp.ne.s32.totalorder (!%p1041_p5), %s1034_s24, 0 }
  0x4a   : > { %218 = sbr.rel (%p1041_p5) target bundleno = 502 (0x1f6), region = 40  ;;  %s489_s17 = sshll.u32 (!%p1041_p5), %s945_s16, 3 }
  0x4b   : > { %s221_s23 = scalar_lea.sflag (!%p1041_p5), [#allocation3], %s945_s16  ;;  %s224_s27 = scalar_lea.vmem (!%p1041_p5), [#allocation2], %s489_s17 }
  0x51   : > { %744 = dma.done.wait (%p1042_p0), %s221_s23, 128  }
  0x52   : > { %746 = vsyncadd (%p1042_p0), %s221_s23, 4294967168  ;;  %p1043_p11 = scmp.eq.s32.totalorder %s830_s22, 0 }
  0x54   : > { %748 = dma.done.wait (%p1043_p11), [#allocation6], 2048   ;;  %p1044_p1 = pmov %p1043_p11 }
  0x55   : > { %v959_v0 = vld [vmem:[%s224_s27] sm:$0xff]  ;;  %v293_v2 = vld [vmem:[#allocation5] sm:$0xff]  ;;  %v294_v3 = vld [vmem:[#allocation5 + $0x8] sm:$0xff]  ;;  %v775_v5 = vmov 0.0|0.0   ;;  %vm776_vm0 = vmmov 0   ;;  %v777_v17 = vmov 0.0  }
  0x56   : > { %750 = vsyncadd (%p1044_p1), [#allocation6], 4294965248  ;;  %258 = vadd.xlane.f32.xlu0 %v959_v0  ;;  %v260_v1 = vmul.f32 %v959_v0, %v959_v0  ;;  %v552_v4 = vpack.c.bf16 %v294_v3, %v293_v2  ;;  %551 = vmatprep.subr.bf16.mxu0 %v775_v5  ;;  %v295_v6 = vld [vmem:[#allocation5 + $0x10] sm:$0xff]  ;;  %v296_v7 = vld [vmem:[#allocation5 + $0x18] sm:$0xff]  ;;  %s496_s11 = sshll.u32 %s830_s22, 7  ;;  %s254_s12 = scalar_lea.vmem [#allocation7], %s489_s17 }
  0x57   : > { %v555_v8 = vpack.c.bf16 %v296_v7, %v295_v6  ;;  %v297_v9 = vld [vmem:[#allocation5 + $0x20] sm:$0xff]  ;;  %v298_v10 = vld [vmem:[#allocation5 + $0x28] sm:$0xff]  ;;  %v299_v12 = vld [vmem:[#allocation5 + $0x30] sm:$0xff]  ;;  %548 = vmatprep.mubr.msk.f32.mxu0 %vm776_vm0, %v777_v17  ;;  %s402_s10 = sshll.u32 %s254_s12, 4  ;;  %s981_s28 = scalar_lea.hbm %s1030_s5, %s496_s11  ;;  %s983_s10 = int_to_ptr.vmem [resolvable:$true] %s402_s10 }
  0x58   : > { %553 = vmatpush3.bf16.msra.mxu0 %v552_v4  ;;  %v558_v11 = vpack.c.bf16 %v298_v10, %v297_v9  ;;  %v300_v13 = vld [vmem:[#allocation5 + $0x38] sm:$0xff]  ;;  %v301_v15 = vld [vmem:[#allocation5 + $0x40] sm:$0xff]  ;;  %v302_v16 = vld [vmem:[#allocation5 + $0x48] sm:$0xff]  ;;  %s389_s23 = scalar_lea.sflag [#allocation4], %s945_s16  ;;  %s699_s22 = scalar_lea.vmem %s983_s10, 128 }
  0x59   : > { %554 = vmatprep.subr.bf16.mxu0 %v775_v5  ;;  %v561_v14 = vpack.c.bf16 %v300_v13, %v299_v12  ;;  %v564_v18 = vpack.c.bf16 %v302_v16, %v301_v15  ;;  %v303_v19 = vld [vmem:[#allocation5 + $0x50] sm:$0xff]  ;;  %v304_v20 = vld [vmem:[#allocation5 + $0x58] sm:$0xff]  ;;  %v305_v22 = vld [vmem:[#allocation5 + $0x60] sm:$0xff]  ;;  %p700_p4 = scmp.ne.s32.totalorder %s983_s10, %s699_s22  ;;  %s778_s17 = smov [#allocation7]  }
  0x5a   : > { %261 = vadd.xlane.f32.xlu0 %v260_v1  ;;  %v567_v21 = vpack.c.bf16 %v304_v20, %v303_v19  ;;  %v306_v23 = vld [vmem:[#allocation5 + $0x68] sm:$0xff]  ;;  %v307_v25 = vld [vmem:[#allocation5 + $0x70] sm:$0xff]  ;;  %v308_v26 = vld [vmem:[#allocation5 + $0x78] sm:$0xff]  ;;  %s703_s27 = sshll.u32 %s778_s17, 4  ;;  %s704_s27 = int_to_ptr.vmem [resolvable:$false] %s703_s27 }
  0x5b   : > { %v570_v24 = vpack.c.bf16 %v306_v23, %v305_v22  ;;  %v573_v27 = vpack.c.bf16 %v308_v26, %v307_v25  ;;  %v492_v43 = vld [vmem:[%s1028_s3] ss:$0 sm:$0xff]  ;;  %p701_p6 = pnand %p700_p4, %p900_p12  ;;  %s705_s24 = scalar_lea.vmem %s704_s27, 256 }
  0x5c   : > { %556 = vmatpush3.bf16.msra.mxu0 %v555_v8  ;;  %v493_v45 = vld [vmem:[%s1029_s4] ss:$0 sm:$0xff]  ;;  %p706_p10 = scmp.lt.s32.totalorder %s983_s10, %s704_s27  ;;  %p707_p13 = scmp.lt.s32.totalorder %s705_s24, %s699_s22 }
  0x5d   : > { %557 = vmatprep.subr.bf16.mxu0 %v775_v5  ;;  %v494_v48 = vld [vmem:[%s1027_s2] ss:$0 sm:$0xff]  ;;  %p702_p8 = pneg %p701_p6 }
  0x5e   : > { %p708_p3 = por %p707_p13, %p706_p10 }
  0x60   : > { %559 = vmatpush3.bf16.msra.mxu0 %v558_v11  ;;  %p709_p7 = pnand %p708_p3, %p702_p8 }
  0x61   : > { %560 = vmatprep.subr.bf16.mxu0 %v775_v5 }
  0x64   : > { %562 = vmatpush3.bf16.msra.mxu0 %v561_v14 }
  0x65   : > { %563 = vmatprep.subr.bf16.mxu0 %v775_v5 }
  0x68   : > { %565 = vmatpush3.bf16.msra.mxu0 %v564_v18 }
  0x69   : > { %566 = vmatprep.subr.bf16.mxu0 %v775_v5 }
  0x6c   : > { %568 = vmatpush3.bf16.msra.mxu0 %v567_v21 }
  0x6d   : > { %569 = vmatprep.subr.bf16.mxu0 %v775_v5 }
  0x70   : > { %571 = vmatpush3.bf16.msra.mxu0 %v570_v24 }
  0x71   : > { %572 = vmatprep.subr.bf16.mxu0 %v775_v5 }
  0x74   : > { %574 = vmatpush3.bf16.msra.mxu0 %v573_v27 }
  0xe3   : > { %v259_v28 = vpop.xlane.xlu0 %258 }
  0xe4   : > { %v263_v29 = vmul.f32 0.03125, %v259_v28 }
  0xe6   : > { %v264_v30 = vmul.f32 %v263_v29, %v259_v28  ;;  %v277_v41 = vsub.f32 %v959_v0, %v263_v29 }
  0xe7   : > { %v262_v31 = vpop.xlane.xlu0 %261 }
  0xe8   : > { %v265_v32 = vsub.f32 %v262_v31, %v264_v30 }
  0xea   : > { %v266_v33 = vmul.f32 0.032258064, %v265_v32 }
  0xec   : > { %v267_v34 = vmax.f32 %v266_v33, 0.0 }
  0xee   : > { %637 = vrsqrt.f32 %v267_v34  ;;  %vm270_vm1 = vcmp.eq.f32.partialorder %v267_v34, inf  ;;  %v273_v37 = vand.u32 2147483648, %v267_v34  ;;  %vm272_vm2 = vcmp.eq.f32.partialorder %v267_v34, 0.0 }
  0xf8   : > { %v638_v35 = vpop.eup %637 }
  0xf9   : > { %v269_v36 = vmul.f32 %v638_v35, %v267_v34 }
  0xfb   : > { %v271_v38 = vsel %vm270_vm1, %v267_v34, %v269_v36 }
  0xfc   : > { %v274_v39 = vsel %vm272_vm2, %v273_v37, %v271_v38 }
  0xfd   : > { %v275_v40 = vadd.f32 1e-06, %v274_v39 }
  0xff   : > { %639 = vrcp.f32 %v275_v40 }
 0x109   : > { %v640_v42 = vpop.eup %639 }
 0x10a   : > { %v278_v44 = vmul.f32 %v640_v42, %v277_v41 }
 0x10c   : > { %v285_v46 = vmul.f32 %v492_v43, %v278_v44 }
 0x10e   : > { %v292_v47 = vadd.f32 %v493_v45, %v285_v46 }
 0x110   : > { %549 = vmatmul.mubr.f32.vlgmr.msra.gmra.mrb[0].mxu0 %v292_v47 }
 0x1e3   : > { %v382_v49 = vpop.f32.mrb[0].mxu0 }
 0x1e4   : > { %v383_v50 = vadd.f32 %v494_v48, %v382_v49  ;;  %v550_v51 = vpop.f32.mrb[1].mxu0 }
 0x1e6   : > { %v386_v52 = vadd.f32 %v383_v50, %v959_v0 }
 0x1e8   : > { %387 = vst [vmem:[%s254_s12] sm:$0xff] %v386_v52 }
 0x1e9   : > { %712 = shalt.err (!%p709_p7)
}
 0x1ea   : > { %s713_s16 = scalar_lea.hbm %s981_s28, 128  ;;  %s717_s6 = scalar_lea.hbm %s1030_s5, 256 }
 0x1eb   : > { %p714_p9 = scmp.ne.s32.totalorder %s981_s28, %s713_s16  ;;  %p718_p0 = scmp.lt.u32.totalorder %s981_s28, %s1030_s5 }
 0x1ec   : > { %p719_p11 = scmp.lt.u32.totalorder %s717_s6, %s713_s16  ;;  %p721_p4 = scmp.lt.u32.totalorder %s713_s16, %s981_s28 }
 0x1ed   : > { %p715_p2 = pnand %p714_p9, %p900_p12 }
 0x1ee   : > { %p720_p1 = por %p719_p11, %p718_p0 }
 0x1ef   : > { %p716_p5 = pneg %p715_p2 }
 0x1f0   : > { %p722_p6 = por %p721_p4, %p720_p1 }
 0x1f2   : > { %p723_p8 = pnand %p722_p6, %p716_p5 }
 0x1f4   : > { %726 = shalt.err (!%p723_p8)
}
 0x1f5   : > { %581 = dma.vmem_to_hbm [thread:$0]  (%p900_p12), %s983_s10, 128, %s981_s28, %s389_s23  }
 0x1f6 PF: > { %s414_s11 = sand.u32 1, %s757_s18   ;;  %p1045_p10 = scmp.ne.s32.totalorder %s1035_s25, 0 }
 0x1f7   : > { %p1046_p13 = scmp.ge.s32.totalorder %s769_s21, 2  ;;  %s415_s12 = scalar_lea.sflag [#allocation4], %s414_s11 }
 0x1f9   : > { %p592_p3 = pnand %p1046_p13, %p1045_p10 }
 0x1fb   : > { %752 = dma.done.wait (!%p592_p3), %s415_s12, 128  }
 0x1fc   : > { %754 = vsyncadd (!%p592_p3), %s415_s12, 4294967168  ;;  %p19_p7 = scmp.ge.s32.totalorder %s865_s30, 4   ;;  %s1047_s18 = smov %s761_s19 }
 0x1fd   : > { %s1048_s19 = smov %s765_s20  ;;  %s1049_s20 = smov %s896_s8 }
 0x1fe   : > { %s1050_s21 = smov %s865_s30  ;;  %21 = sbr.rel (!%p19_p7) target bundleno = 6 (0x6), region = 89 }
 0x205   :  { %420 = vsyncpa [#allocation3], 1 }
 0x206   :  { %422 = vsyncpa [#allocation3 + $0x1], 1 }
 0x207   :  { %423 = vsyncpa [#allocation6], 1 }
 0x208   :  { %424 = vsyncpa [#allocation4], 1 }
 0x209   :  { %426 = vsyncpa [#allocation4 + $0x1], 1 }

</bundles_post_ra>
